<compile_context>
chip_gen: v7x
topology: tpu7x:2x2x1
jax: 0.10.0
libtpu: 0.0.40
codegen_flags: <defaults>
</compile_context>

<pallas_src>
import functools
import numpy as np

import jax
import jax.numpy as jnp
from jax.experimental import pallas as pl
from jax.experimental.pallas import tpu as pltpu


def _round_up(x, m):
    return ((x + m - 1) // m) * m


# ----------------------------- Pallas kernel -------------------------------

def fftnet_kernel(xa_ref, xb_ref, wl_ref, wr_ref, bz_ref, wp_ref, bp_ref,
                  wlast_ref, blast_ref, out_ref, *, layers, rfield, tile_t):
    """One grid point = (batch b, time tile tt) -> TILE_T output steps.

    xa_ref/xb_ref : (1, TILE_T, C) bf16 — two adjacent TILE_T blocks of the
                    padded signal; together they cover the halo window
                    xp[t0 : t0 + TILE_T + R].
    wl/wr/wp      : (L, C, C) bf16 stacked 1x1-conv weights (in->out: y = x@W)
    bz            : (L, 1, C) f32 (bl + br pre-added in the wrapper)
    bp            : (L, 1, C) f32
    wlast         : (C, C) bf16 ; blast : (1, C) f32
    out_ref       : (1, TILE_T, C) f32
    """
    # Halo window of the padded input for this tile: (TILE_T + R, C), bf16.
    win = jnp.concatenate([xa_ref[0], xb_ref[0]], axis=0)
    h = win[: tile_t + rfield, :]

    # Layer-wise dilated FFTNet recurrence over the whole tile:
    #   h_{l+1}[u] = relu(relu(h_l[u]@Wl + h_l[u+d_l]@Wr + b)@Wp + bp),
    # with d_l = R / 2^(l+1).  All slices are static; each layer is a couple
    # of (M, C)@(C, C) bf16 GEMMs accumulated in f32.
    for l in range(layers):
        shift = rfield >> (l + 1)
        m = tile_t + shift                       # rows needed by later layers
        left = h[:m, :]
        right = h[shift:shift + m, :]
        z = (jnp.dot(left, wl_ref[l], preferred_element_type=jnp.float32)
             + jnp.dot(right, wr_ref[l], preferred_element_type=jnp.float32)
             + bz_ref[l])
        hpost = jnp.maximum(z, 0.0).astype(jnp.bfloat16)
        hpost = (jnp.dot(hpost, wp_ref[l], preferred_element_type=jnp.float32)
                 + bp_ref[l])
        h = jnp.maximum(hpost, 0.0).astype(jnp.bfloat16)

    # h has TILE_T + 1 rows; final Linear over channels on the first TILE_T,
    # stored as one lane/sublane-dense tile.
    out = (jnp.dot(h[:tile_t, :], wlast_ref[...],
                   preferred_element_type=jnp.float32) + blast_ref[...])
    out_ref[0] = out


# ------------------------------- wrapper ------------------------------------

def fftnet_forward(x_bct, params, *, layers, tile_t=256):
    """x_bct: (B, C, T) one-hot audio (float32). Returns (B, C, T) float32."""
    B, C, T = x_bct.shape
    R = 2 ** layers  # receptive field

    # Time-tile size: >= R so the halo fits in the next block; multiple of 8.
    tile_t = max(R, min(tile_t, _round_up(T, 8)))
    tile_t = _round_up(tile_t, 8)
    T_pad = _round_up(T, tile_t)
    n_tiles = T_pad // tile_t

    # Dummy-silence left padding: one-hot at the mu-law silence index.
    silence_idx = (C - 1) // 2
    front = jnp.zeros((B, R, C), jnp.float32).at[:, :, silence_idx].set(1.0)
    x_btc = jnp.transpose(x_bct, (0, 2, 1)).astype(jnp.float32)   # (B, T, C)
    # Tail padding so the padded signal length is exactly (n_tiles+1)*TILE_T
    # (the halo block t+1 of the last tile stays in bounds).
    tail = jnp.zeros((B, (T_pad - T) + (tile_t - R), C), jnp.float32)
    xp = jnp.concatenate([front, x_btc, tail], axis=1).astype(jnp.bfloat16)

    bf16 = jnp.bfloat16
    wl = params["wl"].astype(bf16)
    wr = params["wr"].astype(bf16)
    wp = params["wp"].astype(bf16)
    wlast = params["wlast"].astype(bf16)
    bz = (params["bl"] + params["br"]).reshape(layers, 1, C).astype(jnp.float32)
    bp = params["bp"].reshape(layers, 1, C).astype(jnp.float32)
    blast = params["blast"].reshape(1, C).astype(jnp.float32)

    kernel = functools.partial(fftnet_kernel, layers=layers, rfield=R,
                               tile_t=tile_t)

    out_btc = pl.pallas_call(
        kernel,
        out_shape=jax.ShapeDtypeStruct((B, T_pad, C), jnp.float32),
        grid_spec=pltpu.PrefetchScalarGridSpec(
            num_scalar_prefetch=0,
            grid=(B, n_tiles),
            in_specs=[
                pl.BlockSpec((1, tile_t, C), lambda b, t: (b, t, 0)),      # xp tile
                pl.BlockSpec((1, tile_t, C), lambda b, t: (b, t + 1, 0)),  # halo
                pl.BlockSpec((layers, C, C), lambda b, t: (0, 0, 0)),      # wl
                pl.BlockSpec((layers, C, C), lambda b, t: (0, 0, 0)),      # wr
                pl.BlockSpec((layers, 1, C), lambda b, t: (0, 0, 0)),      # bl+br
                pl.BlockSpec((layers, C, C), lambda b, t: (0, 0, 0)),      # wp
                pl.BlockSpec((layers, 1, C), lambda b, t: (0, 0, 0)),      # bp
                pl.BlockSpec((C, C),         lambda b, t: (0, 0)),         # wlast
                pl.BlockSpec((1, C),         lambda b, t: (0, 0)),         # blast
            ],
            out_specs=pl.BlockSpec((1, tile_t, C), lambda b, t: (b, t, 0)),
        ),
        compiler_params=pltpu.CompilerParams(
            dimension_semantics=("parallel", "parallel")),
    )(xp, xp, wl, wr, bz, wp, bp, wlast, blast)

    return jnp.transpose(out_btc[:, :T, :], (0, 2, 1))   # back to (B, C, T)


# ------------------------- pure-JAX reference --------------------------------

def fftnet_reference(x_bct, params, *, layers):
    B, C, T = x_bct.shape
    R = 2 ** layers
    silence_idx = (C - 1) // 2
    pad = jnp.zeros((B, R, C), jnp.float32).at[:, :, silence_idx].set(1.0)
    xp = jnp.concatenate([pad, jnp.transpose(x_bct, (0, 2, 1))], axis=1)
    outs = []
    for t in range(T):
        xc = xp[:, t:t + R, :]
        npts = R
        for l in range(layers):
            npts //= 2
            z = (xc[:, :npts, :] @ params["wl"][l] + params["bl"][l]
                 + xc[:, npts:2 * npts, :] @ params["wr"][l] + params["br"][l])
            xc = jnp.maximum(jnp.maximum(z, 0.0) @ params["wp"][l]
                             + params["bp"][l], 0.0)
        outs.append(xc[:, 0, :] @ params["wlast"] + params["blast"][0])
    return jnp.stack(outs, axis=2)  # (B, C, T)


# --------------------------------- main --------------------------------------

if __name__ == "__main__":
    # Small config consistent with FFTNet(in_channels=out_channels=C, layers=L)
    B, C, T = 2, 64, 16
    LAYERS = 4                       # receptive_field = 2**4 = 16

    key = jax.random.PRNGKey(0)
    keys = jax.random.split(key, 10)
    scale = 1.0 / np.sqrt(C)

    # Weights stored as (in, out) so that y = x @ W + b  (== Conv1d1x1 / Linear).
    params = {
        "wl":    scale * jax.random.normal(keys[0], (LAYERS, C, C), jnp.float32),
        "bl":    0.01 * jax.random.normal(keys[1], (LAYERS, C), jnp.float32),
        "wr":    scale * jax.random.normal(keys[2], (LAYERS, C, C), jnp.float32),
        "br":    0.01 * jax.random.normal(keys[3], (LAYERS, C), jnp.float32),
        "wp":    scale * jax.random.normal(keys[4], (LAYERS, C, C), jnp.float32),
        "bp":    0.01 * jax.random.normal(keys[5], (LAYERS, C), jnp.float32),
        "wlast": scale * jax.random.normal(keys[6], (C, C), jnp.float32),
        "blast": 0.01 * jax.random.normal(keys[7], (1, C), jnp.float32),
    }

    # One-hot encoded audio signal, shape (B, C, T).
    labels = jax.random.randint(keys[8], (B, T), 0, C)
    x = jax.nn.one_hot(labels, C, dtype=jnp.float32)          # (B, T, C)
    x = jnp.transpose(x, (0, 2, 1))                            # (B, C, T)

    out = fftnet_forward(x, params, layers=LAYERS)
    out = jax.block_until_ready(out)

    ref = fftnet_reference(x, params, layers=LAYERS)
    # bf16 MXU operands (f32 accumulation) -> slightly looser tolerance.
    np.testing.assert_allclose(np.asarray(out), np.asarray(ref),
                               rtol=2e-2, atol=2e-2)

    print("KERNEL_OK")
</pallas_src>

<mosaic_0001>
module attributes {stable_mosaic.version = 11 : i64} {
  func.func @fftnet_kernel(%arg0: i32, %arg1: i32, %arg2: memref<1x16x64xbf16, #tpu.memory_space<vmem>>, %arg3: memref<1x16x64xbf16, #tpu.memory_space<vmem>>, %arg4: memref<4x64x64xbf16, #tpu.memory_space<vmem>>, %arg5: memref<4x64x64xbf16, #tpu.memory_space<vmem>>, %arg6: memref<4x1x64xf32, #tpu.memory_space<vmem>>, %arg7: memref<4x64x64xbf16, #tpu.memory_space<vmem>>, %arg8: memref<4x1x64xf32, #tpu.memory_space<vmem>>, %arg9: memref<64x64xbf16, #tpu.memory_space<vmem>>, %arg10: memref<1x64xf32, #tpu.memory_space<vmem>>, %arg11: memref<1x16x64xf32, #tpu.memory_space<vmem>>) attributes {dimension_semantics = [#tpu.dimension_semantics<parallel>, #tpu.dimension_semantics<parallel>], iteration_bounds = array<i64: 2, 1>, scalar_prefetch = 0 : i64, scratch_operands = 0 : i64, tpu.core_type = #tpu.core_type<tc>, window_params = [{transform_indices = @transform_0, window_bounds = array<i64: 1, 16, 64>}, {transform_indices = @transform_1, window_bounds = array<i64: 1, 16, 64>}, {pipeline_mode = #tpu.pipeline_mode<synchronous>, transform_indices = @transform_2, window_bounds = array<i64: 4, 64, 64>}, {pipeline_mode = #tpu.pipeline_mode<synchronous>, transform_indices = @transform_3, window_bounds = array<i64: 4, 64, 64>}, {pipeline_mode = #tpu.pipeline_mode<synchronous>, transform_indices = @transform_4, window_bounds = array<i64: 4, 1, 64>}, {pipeline_mode = #tpu.pipeline_mode<synchronous>, transform_indices = @transform_5, window_bounds = array<i64: 4, 64, 64>}, {pipeline_mode = #tpu.pipeline_mode<synchronous>, transform_indices = @transform_6, window_bounds = array<i64: 4, 1, 64>}, {pipeline_mode = #tpu.pipeline_mode<synchronous>, transform_indices = @transform_7, window_bounds = array<i64: 64, 64>}, {pipeline_mode = #tpu.pipeline_mode<synchronous>, transform_indices = @transform_8, window_bounds = array<i64: 1, 64>}, {transform_indices = @transform_9, window_bounds = array<i64: 1, 16, 64>}]} {
    %c0 = arith.constant 0 : index
    %c0_0 = arith.constant 0 : index
    %c0_1 = arith.constant 0 : index
    %0 = vector.load %arg2[%c0, %c0_0, %c0_1] : memref<1x16x64xbf16, #tpu.memory_space<vmem>>, vector<1x16x64xbf16>
    %1 = vector.shape_cast %0 : vector<1x16x64xbf16> to vector<16x64xbf16>
    %c0_2 = arith.constant 0 : index
    %c0_3 = arith.constant 0 : index
    %c0_4 = arith.constant 0 : index
    %2 = vector.load %arg3[%c0_2, %c0_3, %c0_4] : memref<1x16x64xbf16, #tpu.memory_space<vmem>>, vector<1x16x64xbf16>
    %3 = vector.shape_cast %2 : vector<1x16x64xbf16> to vector<16x64xbf16>
    %4 = tpu.concatenate %1, %3 in 0 : vector<16x64xbf16>, vector<16x64xbf16> -> vector<32x64xbf16>
    %5 = vector.extract_strided_slice %4 {offsets = [0, 0], sizes = [24, 64], strides = [1, 1]} : vector<32x64xbf16> to vector<24x64xbf16>
    %6 = vector.extract_strided_slice %4 {offsets = [8, 0], sizes = [24, 64], strides = [1, 1]} : vector<32x64xbf16> to vector<24x64xbf16>
    %c0_5 = arith.constant 0 : index
    %c0_6 = arith.constant 0 : index
    %c0_7 = arith.constant 0 : index
    %7 = vector.load %arg4[%c0_5, %c0_6, %c0_7] : memref<4x64x64xbf16, #tpu.memory_space<vmem>>, vector<1x64x64xbf16>
    %8 = vector.shape_cast %7 : vector<1x64x64xbf16> to vector<64x64xbf16>
    %cst = arith.constant dense<0.000000e+00> : vector<24x64xf32>
    %9 = tpu.matmul %5, %8, %cst {dimension_numbers = #tpu.dot_dimension_numbers<[1], [0], [0], [1], [0, 0, 1, 1], [], []>} : vector<24x64xbf16>, vector<64x64xbf16>, vector<24x64xf32> -> vector<24x64xf32>
    %c0_8 = arith.constant 0 : index
    %c0_9 = arith.constant 0 : index
    %c0_10 = arith.constant 0 : index
    %10 = vector.load %arg5[%c0_8, %c0_9, %c0_10] : memref<4x64x64xbf16, #tpu.memory_space<vmem>>, vector<1x64x64xbf16>
    %11 = vector.shape_cast %10 : vector<1x64x64xbf16> to vector<64x64xbf16>
    %cst_11 = arith.constant dense<0.000000e+00> : vector<24x64xf32>
    %12 = tpu.matmul %6, %11, %cst_11 {dimension_numbers = #tpu.dot_dimension_numbers<[1], [0], [0], [1], [0, 0, 1, 1], [], []>} : vector<24x64xbf16>, vector<64x64xbf16>, vector<24x64xf32> -> vector<24x64xf32>
    %13 = arith.addf %9, %12 : vector<24x64xf32>
    %c0_12 = arith.constant 0 : index
    %c0_13 = arith.constant 0 : index
    %c0_14 = arith.constant 0 : index
    %14 = vector.load %arg6[%c0_12, %c0_13, %c0_14] : memref<4x1x64xf32, #tpu.memory_space<vmem>>, vector<1x1x64xf32>
    %15 = vector.shape_cast %14 : vector<1x1x64xf32> to vector<1x64xf32>
    %16 = vector.broadcast %15 : vector<1x64xf32> to vector<24x64xf32>
    %17 = arith.addf %13, %16 : vector<24x64xf32>
    %cst_15 = arith.constant 0.000000e+00 : f32
    %18 = vector.broadcast %cst_15 : f32 to vector<24x64xf32>
    %19 = arith.maximumf %17, %18 : vector<24x64xf32>
    %20 = arith.truncf %19 : vector<24x64xf32> to vector<24x64xbf16>
    %c0_16 = arith.constant 0 : index
    %c0_17 = arith.constant 0 : index
    %c0_18 = arith.constant 0 : index
    %21 = vector.load %arg7[%c0_16, %c0_17, %c0_18] : memref<4x64x64xbf16, #tpu.memory_space<vmem>>, vector<1x64x64xbf16>
    %22 = vector.shape_cast %21 : vector<1x64x64xbf16> to vector<64x64xbf16>
    %cst_19 = arith.constant dense<0.000000e+00> : vector<24x64xf32>
    %23 = tpu.matmul %20, %22, %cst_19 {dimension_numbers = #tpu.dot_dimension_numbers<[1], [0], [0], [1], [0, 0, 1, 1], [], []>} : vector<24x64xbf16>, vector<64x64xbf16>, vector<24x64xf32> -> vector<24x64xf32>
    %c0_20 = arith.constant 0 : index
    %c0_21 = arith.constant 0 : index
    %c0_22 = arith.constant 0 : index
    %24 = vector.load %arg8[%c0_20, %c0_21, %c0_22] : memref<4x1x64xf32, #tpu.memory_space<vmem>>, vector<1x1x64xf32>
    %25 = vector.shape_cast %24 : vector<1x1x64xf32> to vector<1x64xf32>
    %26 = vector.broadcast %25 : vector<1x64xf32> to vector<24x64xf32>
    %27 = arith.addf %23, %26 : vector<24x64xf32>
    %cst_23 = arith.constant 0.000000e+00 : f32
    %28 = vector.broadcast %cst_23 : f32 to vector<24x64xf32>
    %29 = arith.maximumf %27, %28 : vector<24x64xf32>
    %30 = arith.truncf %29 : vector<24x64xf32> to vector<24x64xbf16>
    %31 = vector.extract_strided_slice %30 {offsets = [0, 0], sizes = [20, 64], strides = [1, 1]} : vector<24x64xbf16> to vector<20x64xbf16>
    %32 = vector.extract_strided_slice %30 {offsets = [4, 0], sizes = [20, 64], strides = [1, 1]} : vector<24x64xbf16> to vector<20x64xbf16>
    %c1 = arith.constant 1 : index
    %c0_24 = arith.constant 0 : index
    %c0_25 = arith.constant 0 : index
    %33 = vector.load %arg4[%c1, %c0_24, %c0_25] : memref<4x64x64xbf16, #tpu.memory_space<vmem>>, vector<1x64x64xbf16>
    %34 = vector.shape_cast %33 : vector<1x64x64xbf16> to vector<64x64xbf16>
    %cst_26 = arith.constant dense<0.000000e+00> : vector<20x64xf32>
    %35 = tpu.matmul %31, %34, %cst_26 {dimension_numbers = #tpu.dot_dimension_numbers<[1], [0], [0], [1], [0, 0, 1, 1], [], []>} : vector<20x64xbf16>, vector<64x64xbf16>, vector<20x64xf32> -> vector<20x64xf32>
    %c1_27 = arith.constant 1 : index
    %c0_28 = arith.constant 0 : index
    %c0_29 = arith.constant 0 : index
    %36 = vector.load %arg5[%c1_27, %c0_28, %c0_29] : memref<4x64x64xbf16, #tpu.memory_space<vmem>>, vector<1x64x64xbf16>
    %37 = vector.shape_cast %36 : vector<1x64x64xbf16> to vector<64x64xbf16>
    %cst_30 = arith.constant dense<0.000000e+00> : vector<20x64xf32>
    %38 = tpu.matmul %32, %37, %cst_30 {dimension_numbers = #tpu.dot_dimension_numbers<[1], [0], [0], [1], [0, 0, 1, 1], [], []>} : vector<20x64xbf16>, vector<64x64xbf16>, vector<20x64xf32> -> vector<20x64xf32>
    %39 = arith.addf %35, %38 : vector<20x64xf32>
    %c1_31 = arith.constant 1 : index
    %c0_32 = arith.constant 0 : index
    %c0_33 = arith.constant 0 : index
    %40 = vector.load %arg6[%c1_31, %c0_32, %c0_33] : memref<4x1x64xf32, #tpu.memory_space<vmem>>, vector<1x1x64xf32>
    %41 = vector.shape_cast %40 : vector<1x1x64xf32> to vector<1x64xf32>
    %42 = vector.broadcast %41 : vector<1x64xf32> to vector<20x64xf32>
    %43 = arith.addf %39, %42 : vector<20x64xf32>
    %cst_34 = arith.constant 0.000000e+00 : f32
    %44 = vector.broadcast %cst_34 : f32 to vector<20x64xf32>
    %45 = arith.maximumf %43, %44 : vector<20x64xf32>
    %46 = arith.truncf %45 : vector<20x64xf32> to vector<20x64xbf16>
    %c1_35 = arith.constant 1 : index
    %c0_36 = arith.constant 0 : index
    %c0_37 = arith.constant 0 : index
    %47 = vector.load %arg7[%c1_35, %c0_36, %c0_37] : memref<4x64x64xbf16, #tpu.memory_space<vmem>>, vector<1x64x64xbf16>
    %48 = vector.shape_cast %47 : vector<1x64x64xbf16> to vector<64x64xbf16>
    %cst_38 = arith.constant dense<0.000000e+00> : vector<20x64xf32>
    %49 = tpu.matmul %46, %48, %cst_38 {dimension_numbers = #tpu.dot_dimension_numbers<[1], [0], [0], [1], [0, 0, 1, 1], [], []>} : vector<20x64xbf16>, vector<64x64xbf16>, vector<20x64xf32> -> vector<20x64xf32>
    %c1_39 = arith.constant 1 : index
    %c0_40 = arith.constant 0 : index
    %c0_41 = arith.constant 0 : index
    %50 = vector.load %arg8[%c1_39, %c0_40, %c0_41] : memref<4x1x64xf32, #tpu.memory_space<vmem>>, vector<1x1x64xf32>
    %51 = vector.shape_cast %50 : vector<1x1x64xf32> to vector<1x64xf32>
    %52 = vector.broadcast %51 : vector<1x64xf32> to vector<20x64xf32>
    %53 = arith.addf %49, %52 : vector<20x64xf32>
    %cst_42 = arith.constant 0.000000e+00 : f32
    %54 = vector.broadcast %cst_42 : f32 to vector<20x64xf32>
    %55 = arith.maximumf %53, %54 : vector<20x64xf32>
    %56 = arith.truncf %55 : vector<20x64xf32> to vector<20x64xbf16>
    %57 = vector.extract_strided_slice %56 {offsets = [0, 0], sizes = [18, 64], strides = [1, 1]} : vector<20x64xbf16> to vector<18x64xbf16>
    %58 = vector.extract_strided_slice %56 {offsets = [2, 0], sizes = [18, 64], strides = [1, 1]} : vector<20x64xbf16> to vector<18x64xbf16>
    %c2 = arith.constant 2 : index
    %c0_43 = arith.constant 0 : index
    %c0_44 = arith.constant 0 : index
    %59 = vector.load %arg4[%c2, %c0_43, %c0_44] : memref<4x64x64xbf16, #tpu.memory_space<vmem>>, vector<1x64x64xbf16>
    %60 = vector.shape_cast %59 : vector<1x64x64xbf16> to vector<64x64xbf16>
    %cst_45 = arith.constant dense<0.000000e+00> : vector<18x64xf32>
    %61 = tpu.matmul %57, %60, %cst_45 {dimension_numbers = #tpu.dot_dimension_numbers<[1], [0], [0], [1], [0, 0, 1, 1], [], []>} : vector<18x64xbf16>, vector<64x64xbf16>, vector<18x64xf32> -> vector<18x64xf32>
    %c2_46 = arith.constant 2 : index
    %c0_47 = arith.constant 0 : index
    %c0_48 = arith.constant 0 : index
    %62 = vector.load %arg5[%c2_46, %c0_47, %c0_48] : memref<4x64x64xbf16, #tpu.memory_space<vmem>>, vector<1x64x64xbf16>
    %63 = vector.shape_cast %62 : vector<1x64x64xbf16> to vector<64x64xbf16>
    %cst_49 = arith.constant dense<0.000000e+00> : vector<18x64xf32>
    %64 = tpu.matmul %58, %63, %cst_49 {dimension_numbers = #tpu.dot_dimension_numbers<[1], [0], [0], [1], [0, 0, 1, 1], [], []>} : vector<18x64xbf16>, vector<64x64xbf16>, vector<18x64xf32> -> vector<18x64xf32>
    %65 = arith.addf %61, %64 : vector<18x64xf32>
    %c2_50 = arith.constant 2 : index
    %c0_51 = arith.constant 0 : index
    %c0_52 = arith.constant 0 : index
    %66 = vector.load %arg6[%c2_50, %c0_51, %c0_52] : memref<4x1x64xf32, #tpu.memory_space<vmem>>, vector<1x1x64xf32>
    %67 = vector.shape_cast %66 : vector<1x1x64xf32> to vector<1x64xf32>
    %68 = vector.broadcast %67 : vector<1x64xf32> to vector<18x64xf32>
    %69 = arith.addf %65, %68 : vector<18x64xf32>
    %cst_53 = arith.constant 0.000000e+00 : f32
    %70 = vector.broadcast %cst_53 : f32 to vector<18x64xf32>
    %71 = arith.maximumf %69, %70 : vector<18x64xf32>
    %72 = arith.truncf %71 : vector<18x64xf32> to vector<18x64xbf16>
    %c2_54 = arith.constant 2 : index
    %c0_55 = arith.constant 0 : index
    %c0_56 = arith.constant 0 : index
    %73 = vector.load %arg7[%c2_54, %c0_55, %c0_56] : memref<4x64x64xbf16, #tpu.memory_space<vmem>>, vector<1x64x64xbf16>
    %74 = vector.shape_cast %73 : vector<1x64x64xbf16> to vector<64x64xbf16>
    %cst_57 = arith.constant dense<0.000000e+00> : vector<18x64xf32>
    %75 = tpu.matmul %72, %74, %cst_57 {dimension_numbers = #tpu.dot_dimension_numbers<[1], [0], [0], [1], [0, 0, 1, 1], [], []>} : vector<18x64xbf16>, vector<64x64xbf16>, vector<18x64xf32> -> vector<18x64xf32>
    %c2_58 = arith.constant 2 : index
    %c0_59 = arith.constant 0 : index
    %c0_60 = arith.constant 0 : index
    %76 = vector.load %arg8[%c2_58, %c0_59, %c0_60] : memref<4x1x64xf32, #tpu.memory_space<vmem>>, vector<1x1x64xf32>
    %77 = vector.shape_cast %76 : vector<1x1x64xf32> to vector<1x64xf32>
    %78 = vector.broadcast %77 : vector<1x64xf32> to vector<18x64xf32>
    %79 = arith.addf %75, %78 : vector<18x64xf32>
    %cst_61 = arith.constant 0.000000e+00 : f32
    %80 = vector.broadcast %cst_61 : f32 to vector<18x64xf32>
    %81 = arith.maximumf %79, %80 : vector<18x64xf32>
    %82 = arith.truncf %81 : vector<18x64xf32> to vector<18x64xbf16>
    %83 = vector.extract_strided_slice %82 {offsets = [0, 0], sizes = [17, 64], strides = [1, 1]} : vector<18x64xbf16> to vector<17x64xbf16>
    %84 = vector.extract_strided_slice %82 {offsets = [1, 0], sizes = [17, 64], strides = [1, 1]} : vector<18x64xbf16> to vector<17x64xbf16>
    %c3 = arith.constant 3 : index
    %c0_62 = arith.constant 0 : index
    %c0_63 = arith.constant 0 : index
    %85 = vector.load %arg4[%c3, %c0_62, %c0_63] : memref<4x64x64xbf16, #tpu.memory_space<vmem>>, vector<1x64x64xbf16>
    %86 = vector.shape_cast %85 : vector<1x64x64xbf16> to vector<64x64xbf16>
    %cst_64 = arith.constant dense<0.000000e+00> : vector<17x64xf32>
    %87 = tpu.matmul %83, %86, %cst_64 {dimension_numbers = #tpu.dot_dimension_numbers<[1], [0], [0], [1], [0, 0, 1, 1], [], []>} : vector<17x64xbf16>, vector<64x64xbf16>, vector<17x64xf32> -> vector<17x64xf32>
    %c3_65 = arith.constant 3 : index
    %c0_66 = arith.constant 0 : index
    %c0_67 = arith.constant 0 : index
    %88 = vector.load %arg5[%c3_65, %c0_66, %c0_67] : memref<4x64x64xbf16, #tpu.memory_space<vmem>>, vector<1x64x64xbf16>
    %89 = vector.shape_cast %88 : vector<1x64x64xbf16> to vector<64x64xbf16>
    %cst_68 = arith.constant dense<0.000000e+00> : vector<17x64xf32>
    %90 = tpu.matmul %84, %89, %cst_68 {dimension_numbers = #tpu.dot_dimension_numbers<[1], [0], [0], [1], [0, 0, 1, 1], [], []>} : vector<17x64xbf16>, vector<64x64xbf16>, vector<17x64xf32> -> vector<17x64xf32>
    %91 = arith.addf %87, %90 : vector<17x64xf32>
    %c3_69 = arith.constant 3 : index
    %c0_70 = arith.constant 0 : index
    %c0_71 = arith.constant 0 : index
    %92 = vector.load %arg6[%c3_69, %c0_70, %c0_71] : memref<4x1x64xf32, #tpu.memory_space<vmem>>, vector<1x1x64xf32>
    %93 = vector.shape_cast %92 : vector<1x1x64xf32> to vector<1x64xf32>
    %94 = vector.broadcast %93 : vector<1x64xf32> to vector<17x64xf32>
    %95 = arith.addf %91, %94 : vector<17x64xf32>
    %cst_72 = arith.constant 0.000000e+00 : f32
    %96 = vector.broadcast %cst_72 : f32 to vector<17x64xf32>
    %97 = arith.maximumf %95, %96 : vector<17x64xf32>
    %98 = arith.truncf %97 : vector<17x64xf32> to vector<17x64xbf16>
    %c3_73 = arith.constant 3 : index
    %c0_74 = arith.constant 0 : index
    %c0_75 = arith.constant 0 : index
    %99 = vector.load %arg7[%c3_73, %c0_74, %c0_75] : memref<4x64x64xbf16, #tpu.memory_space<vmem>>, vector<1x64x64xbf16>
    %100 = vector.shape_cast %99 : vector<1x64x64xbf16> to vector<64x64xbf16>
    %cst_76 = arith.constant dense<0.000000e+00> : vector<17x64xf32>
    %101 = tpu.matmul %98, %100, %cst_76 {dimension_numbers = #tpu.dot_dimension_numbers<[1], [0], [0], [1], [0, 0, 1, 1], [], []>} : vector<17x64xbf16>, vector<64x64xbf16>, vector<17x64xf32> -> vector<17x64xf32>
    %c3_77 = arith.constant 3 : index
    %c0_78 = arith.constant 0 : index
    %c0_79 = arith.constant 0 : index
    %102 = vector.load %arg8[%c3_77, %c0_78, %c0_79] : memref<4x1x64xf32, #tpu.memory_space<vmem>>, vector<1x1x64xf32>
    %103 = vector.shape_cast %102 : vector<1x1x64xf32> to vector<1x64xf32>
    %104 = vector.broadcast %103 : vector<1x64xf32> to vector<17x64xf32>
    %105 = arith.addf %101, %104 : vector<17x64xf32>
    %cst_80 = arith.constant 0.000000e+00 : f32
    %106 = vector.broadcast %cst_80 : f32 to vector<17x64xf32>
    %107 = arith.maximumf %105, %106 : vector<17x64xf32>
    %108 = arith.truncf %107 : vector<17x64xf32> to vector<17x64xbf16>
    %109 = vector.extract_strided_slice %108 {offsets = [0, 0], sizes = [16, 64], strides = [1, 1]} : vector<17x64xbf16> to vector<16x64xbf16>
    %c0_81 = arith.constant 0 : index
    %c0_82 = arith.constant 0 : index
    %110 = vector.load %arg9[%c0_81, %c0_82] : memref<64x64xbf16, #tpu.memory_space<vmem>>, vector<64x64xbf16>
    %cst_83 = arith.constant dense<0.000000e+00> : vector<16x64xf32>
    %111 = tpu.matmul %109, %110, %cst_83 {dimension_numbers = #tpu.dot_dimension_numbers<[1], [0], [0], [1], [0, 0, 1, 1], [], []>} : vector<16x64xbf16>, vector<64x64xbf16>, vector<16x64xf32> -> vector<16x64xf32>
    %c0_84 = arith.constant 0 : index
    %c0_85 = arith.constant 0 : index
    %112 = vector.load %arg10[%c0_84, %c0_85] : memref<1x64xf32, #tpu.memory_space<vmem>>, vector<1x64xf32>
    %113 = vector.broadcast %112 : vector<1x64xf32> to vector<16x64xf32>
    %114 = arith.addf %111, %113 : vector<16x64xf32>
    %c0_86 = arith.constant 0 : index
    %c0_87 = arith.constant 0 : index
    %c0_88 = arith.constant 0 : index
    %115 = vector.load %arg11[%c0_86, %c0_87, %c0_88] : memref<1x16x64xf32, #tpu.memory_space<vmem>>, vector<1x16x64xf32>
    %116 = vector.shape_cast %115 : vector<1x16x64xf32> to vector<16x64xf32>
    %117 = vector.shape_cast %114 : vector<16x64xf32> to vector<1x16x64xf32>
    tpu.vector_store %arg11[%c0_86, %c0_87, %c0_88], %117 {strides = array<i32>} : memref<1x16x64xf32, #tpu.memory_space<vmem>>, vector<1x16x64xf32>,
    return
  }
  func.func @transform_0(%arg0: i32, %arg1: i32) -> (i32, i32, i32) {
    %c0_i32 = arith.constant 0 : i32
    %c0_i32_0 = arith.constant 0 : i32
    return %arg0, %arg1, %c0_i32 : i32, i32, i32
  }
  func.func @transform_1(%arg0: i32, %arg1: i32) -> (i32, i32, i32) {
    %c1_i32 = arith.constant 1 : i32
    %0 = arith.addi %arg1, %c1_i32 : i32
    %c0_i32 = arith.constant 0 : i32
    %c0_i32_0 = arith.constant 0 : i32
    return %arg0, %0, %c0_i32 : i32, i32, i32
  }
  func.func @transform_2(%arg0: i32, %arg1: i32) -> (i32, i32, i32) {
    %c0_i32 = arith.constant 0 : i32
    %c0_i32_0 = arith.constant 0 : i32
    %c0_i32_1 = arith.constant 0 : i32
    %c0_i32_2 = arith.constant 0 : i32
    return %c0_i32, %c0_i32_0, %c0_i32_1 : i32, i32, i32
  }
  func.func @transform_3(%arg0: i32, %arg1: i32) -> (i32, i32, i32) {
    %c0_i32 = arith.constant 0 : i32
    %c0_i32_0 = arith.constant 0 : i32
    %c0_i32_1 = arith.constant 0 : i32
    %c0_i32_2 = arith.constant 0 : i32
    return %c0_i32, %c0_i32_0, %c0_i32_1 : i32, i32, i32
  }
  func.func @transform_4(%arg0: i32, %arg1: i32) -> (i32, i32, i32) {
    %c0_i32 = arith.constant 0 : i32
    %c0_i32_0 = arith.constant 0 : i32
    %c0_i32_1 = arith.constant 0 : i32
    %c0_i32_2 = arith.constant 0 : i32
    return %c0_i32, %c0_i32_0, %c0_i32_1 : i32, i32, i32
  }
  func.func @transform_5(%arg0: i32, %arg1: i32) -> (i32, i32, i32) {
    %c0_i32 = arith.constant 0 : i32
    %c0_i32_0 = arith.constant 0 : i32
    %c0_i32_1 = arith.constant 0 : i32
    %c0_i32_2 = arith.constant 0 : i32
    return %c0_i32, %c0_i32_0, %c0_i32_1 : i32, i32, i32
  }
  func.func @transform_6(%arg0: i32, %arg1: i32) -> (i32, i32, i32) {
    %c0_i32 = arith.constant 0 : i32
    %c0_i32_0 = arith.constant 0 : i32
    %c0_i32_1 = arith.constant 0 : i32
    %c0_i32_2 = arith.constant 0 : i32
    return %c0_i32, %c0_i32_0, %c0_i32_1 : i32, i32, i32
  }
  func.func @transform_7(%arg0: i32, %arg1: i32) -> (i32, i32) {
    %c0_i32 = arith.constant 0 : i32
    %c0_i32_0 = arith.constant 0 : i32
    %c0_i32_1 = arith.constant 0 : i32
    return %c0_i32, %c0_i32_0 : i32, i32
  }
  func.func @transform_8(%arg0: i32, %arg1: i32) -> (i32, i32) {
    %c0_i32 = arith.constant 0 : i32
    %c0_i32_0 = arith.constant 0 : i32
    %c0_i32_1 = arith.constant 0 : i32
    return %c0_i32, %c0_i32_0 : i32, i32
  }
  func.func @transform_9(%arg0: i32, %arg1: i32) -> (i32, i32, i32) {
    %c0_i32 = arith.constant 0 : i32
    %c0_i32_0 = arith.constant 0 : i32
    return %arg0, %arg1, %c0_i32 : i32, i32, i32
  }
}

</mosaic_0001>

<bundles_post_ra>
// kernel: tpu_custom_call.1
= control target key start
LH: loop header
LB: loop body
LE: loop exit
PB: predicated region body
PF: predicated region fallthrough
CT: control target
= control target key end

     0   :  { %s3209_s0 = inlined_call_operand.hbm [shape: bf16[2,32,64], index: 0, kind: input, shape index: {}]   ;;  %s3210_s1 = inlined_call_operand.hbm [shape: bf16[2,32,64], index: 1, kind: input, shape index: {}]   ;;  %s3211_s2 = inlined_call_operand.hbm [shape: bf16[4,64,64], index: 2, kind: input, shape index: {}]   ;;  %s3212_s3 = inlined_call_operand.hbm [shape: bf16[4,64,64], index: 3, kind: input, shape index: {}]   ;;  %s3213_s4 = inlined_call_operand.vmem [shape: f32[4,1,64], index: 4, kind: input, shape index: {}]   ;;  %s3214_s5 = inlined_call_operand.hbm [shape: bf16[4,64,64], index: 5, kind: input, shape index: {}]   ;;  %s3215_s6 = inlined_call_operand.vmem [shape: f32[4,1,64], index: 6, kind: input, shape index: {}]   ;;  %s3216_s7 = inlined_call_operand.hbm [shape: bf16[64,64], index: 7, kind: input, shape index: {}]   ;;  %s3217_s8 = inlined_call_operand.vmem [shape: f32[1,64], index: 8, kind: input, shape index: {}]   ;;  %s3218_s9 = inlined_call_operand.hbm [shape: f32[2,16,64], index: 9, kind: output, shape index: {}]  }
   0x1   :  { %3229 = sst [smem:[#allocation23_spill]] %s3211_s2 }
   0x2   :  { %3230 = sst [smem:[#allocation24_spill]] %s3212_s3 }
   0x3   :  { %3231 = sst [smem:[#allocation25_spill]] %s3214_s5 }
   0x4   :  { %3232 = sst [smem:[#allocation26_spill]] %s3217_s8 }
   0x5   :  { %3233 = sst [smem:[#allocation27_spill]] %s3218_s9 }
   0x6   :  { %14 = vsyncpa [#allocation3], 0 }
   0x7   :  { %16 = vsyncpa [#allocation3 + $0x1], 0 }
   0x8   :  { %17 = vsyncpa [#allocation6], 0 }
   0x9   :  { %19 = vsyncpa [#allocation6 + $0x1], 0 }
   0xa   :  { %20 = vsyncpa [#allocation9], 0 }
   0xb   :  { %21 = vsyncpa [#allocation12], 0 }
   0xc   :  { %22 = vsyncpa [#allocation4], 0 }
   0xd   :  { %24 = vsyncpa [#allocation4 + $0x1], 0  ;;  %s2789_s30 = smov 0   ;;  %s2791_s10 = smov 0  }
   0xe   :  { %s2793_s11 = smov 0   ;;  %s2795_s12 = smov 0  }
   0xf   :  { %s2797_s13 = smov 0   ;;  %s2799_s14 = smov 0  }
  0x10 LB: > { %3234 = sst [smem:[#allocation20_spill]] %s2704_s30  ;;  %s2820_s15 = sadd.s32 4294967295, %s2724_s14   ;;  %s2724_s14 = sphi %s2799_s14, %s30_s14   ;;  %s2720_s13 = sphi %s2797_s13, %s3270_s13   ;;  %s2716_s12 = sphi %s2795_s12, %s3269_s12   ;;  %s2712_s11 = sphi %s2793_s11, %s3268_s11   ;;  %s2708_s10 = sphi %s2791_s10, %s3267_s10   ;;  %s2704_s30 = sphi %s2789_s30, %s3266_s30  }
  0x11   : > { %3235 = sst [smem:[#allocation21_spill]] %s2716_s12  ;;  %s1929_s16 = sadd.s32 4294967294, %s2724_s14  }
  0x12   : > { %p64_p0 = scmp.ne.s32.totalorder %s2708_s10, %s2704_s30  ;;  %p3220_p1 = scmp.eq.s32.totalorder %s2820_s15, 0 }
  0x13   : > { %p273_p3 = scmp.eq.s32.totalorder %s1929_s16, 1  ;;  %p1930_p5 = scmp.ge.s32.totalorder %s2724_s14, 1 }
  0x14   : > { %p2829_p4 = por %p3220_p1, %p64_p0  ;;  %p280_p7 = scmp.lt.s32.totalorder %s2724_s14, 3 }
  0x15   : > { %p2834_p6 = por %p273_p3, %p64_p0  ;;  %s2726_s20 = smov [#allocation7]  }
  0x16   : > { %s3236_s17 = scalar_select %p2829_p4, 1, 0 }
  0x17   : > { %s3237_s18 = scalar_select %p2834_p6, 1, 0 }
  0x18   : > { %p2839_p8 = pnand %p1930_p5, %p280_p7  ;;  %s292_s21 = sshll.u32 %s2726_s20, 4  ;;  %s2843_s21 = int_to_ptr.vmem [resolvable:$true] %s292_s21 }
  0x19   : > { %3238 = sst [smem:[#allocation22_spill]] %s3237_s18  ;;  %s2727_s23 = smov [#allocation8]  }
  0x1a   : > { %s3239_s19 = scalar_select %p2839_p8, 1, 0 }
  0x1b   : > { %p2307_p9 = pneg %p2839_p8  ;;  %s305_s24 = sshll.u32 %s2727_s23, 4  ;;  %s2854_s24 = int_to_ptr.vmem [resolvable:$true] %s305_s24 }
  0x1c   : > { %s2728_s25 = smov [#allocation10]   ;;  %s3241_s2 = sld [smem:[#allocation23_spill]] }
  0x1d   : > { %p2850_p11 = pnand %p2307_p9, %p3220_p1  ;;  %s2856_s26 = sshll.u32 %s2728_s25, 4  ;;  %s322_s26 = int_to_ptr.vmem [resolvable:$true] %s2856_s26 }
  0x1f   : > { %p2866_p13 = pneg %p2850_p11 }
  0x22   : > { %s2453_s29 = scalar_lea.hbm %s3241_s2, 2048 }
  0x23   : > { %p2454_p12 = scmp.ne.s32.totalorder %s3241_s2, %s2453_s29  ;;  %p2460_p5 = scmp.lt.u32.totalorder %s2453_s29, %s3241_s2 }
  0x25   : > { %p2456_p0 = pnand %p2866_p13, %p2454_p12 }
  0x27   : > { %p2457_p3 = pneg %p2456_p0 }
  0x29   : > { %p2462_p7 = pnand %p2460_p5, %p2457_p3 }
  0x2b   : > { %2465 = shalt.err (!%p2462_p7)
}
  0x2c   : > { %s2466_s27 = scalar_lea.vmem %s2843_s21, 2048  ;;  %p2474_p2 = scmp.lt.s32.totalorder %s2843_s21, %s2843_s21 }
  0x2d   : > { %p2467_p9 = scmp.ne.s32.totalorder %s2843_s21, %s2466_s27  ;;  %p2475_p6 = scmp.lt.s32.totalorder %s2466_s27, %s2466_s27 }
  0x2f   : > { %p2469_p10 = pnand %p2467_p9, %p2866_p13  ;;  %p2476_p12 = por %p2475_p6, %p2474_p2 }
  0x31   : > { %p2470_p1 = pneg %p2469_p10 }
  0x33   : > { %p2477_p0 = pnand %p2476_p12, %p2470_p1 }
  0x35   : > { %2480 = shalt.err (!%p2477_p0)
}
  0x36   : > { %s3225_s28 = smov 64   ;;  %s3227_s29 = smov 4  }
  0x37   : > { %2310 = dma.hbm_to_vmem [thread:$0]  (!%p2850_p11), %s3241_s2, 2048, %s2843_s21, [#allocation6], %s3225_s28, %s3225_s28, %s3227_s29  }
  0x38   : > { %s3243_s3 = sld [smem:[#allocation24_spill]] }
  0x3e   : > { %s2481_s27 = scalar_lea.hbm %s3243_s3, 2048 }
  0x3f   : > { %p2482_p1 = scmp.ne.s32.totalorder %s3243_s3, %s2481_s27  ;;  %p2488_p10 = scmp.lt.u32.totalorder %s2481_s27, %s3243_s3 }
  0x41   : > { %p2484_p2 = pnand %p2482_p1, %p2866_p13 }
  0x43   : > { %p2485_p6 = pneg %p2484_p2 }
  0x45   : > { %p2490_p3 = pnand %p2488_p10, %p2485_p6 }
  0x47   : > { %2493 = shalt.err (!%p2490_p3)
}
  0x48   : > { %s2494_s21 = scalar_lea.vmem %s2854_s24, 2048  ;;  %p2502_p12 = scmp.lt.s32.totalorder %s2854_s24, %s2854_s24 }
  0x49   : > { %p2495_p5 = scmp.ne.s32.totalorder %s2854_s24, %s2494_s21  ;;  %p2503_p0 = scmp.lt.s32.totalorder %s2494_s21, %s2494_s21 }
  0x4b   : > { %p2497_p7 = pnand %p2495_p5, %p2866_p13  ;;  %p2504_p1 = por %p2503_p0, %p2502_p12 }
  0x4d   : > { %p2498_p9 = pneg %p2497_p7 }
  0x4f   : > { %p2505_p2 = pnand %p2504_p1, %p2498_p9 }
  0x51   : > { %2508 = shalt.err (!%p2505_p2)
}
  0x52   : > { %2313 = dma.hbm_to_vmem [thread:$0]  (!%p2850_p11), %s3243_s3, 2048, %s2854_s24, [#allocation9], %s3225_s28, %s3225_s28, %s3227_s29  }
  0x53   : > { %s3244_s5 = sld [smem:[#allocation25_spill]] }
  0x59   : > { %s2509_s16 = scalar_lea.hbm %s3244_s5, 2048 }
  0x5a   : > { %p2510_p6 = scmp.ne.s32.totalorder %s3244_s5, %s2509_s16  ;;  %p2516_p5 = scmp.lt.u32.totalorder %s2509_s16, %s3244_s5 }
  0x5c   : > { %p2512_p10 = pnand %p2510_p6, %p2866_p13 }
  0x5e   : > { %p2513_p3 = pneg %p2512_p10 }
  0x60   : > { %p2518_p7 = pnand %p2516_p5, %p2513_p3 }
  0x62   : > { %2521 = shalt.err (!%p2518_p7)
}
  0x63   : > { %s2522_s21 = scalar_lea.vmem %s322_s26, 2048  ;;  %p2530_p1 = scmp.lt.s32.totalorder %s322_s26, %s322_s26 }
  0x64   : > { %p2523_p9 = scmp.ne.s32.totalorder %s322_s26, %s2522_s21  ;;  %p2531_p2 = scmp.lt.s32.totalorder %s2522_s21, %s2522_s21 }
  0x66   : > { %p2525_p12 = pnand %p2523_p9, %p2866_p13  ;;  %p2532_p4 = por %p2531_p2, %p2530_p1 }
  0x68   : > { %p2526_p0 = pneg %p2525_p12 }
  0x6a   : > { %p2533_p8 = pnand %p2532_p4, %p2526_p0 }
  0x6c   : > { %2536 = shalt.err (!%p2533_p8)
}
  0x6d   : > { %2316 = dma.hbm_to_vmem [thread:$0]  (!%p2850_p11), %s3244_s5, 2048, %s322_s26, [#allocation9], %s3225_s28, %s3225_s28, %s3227_s29  }
  0x6e   : > { %s2731_s9 = smov [#allocation11]   ;;  %s2537_s20 = scalar_lea.hbm %s3216_s7, 512 }
  0x6f   : > { %s337_s30 = sshll.u32 %s2731_s9, 4  ;;  %p2538_p4 = scmp.ne.s32.totalorder %s3216_s7, %s2537_s20  ;;  %s338_s30 = int_to_ptr.vmem [resolvable:$true] %s337_s30 }
  0x70   : > { %p2544_p10 = scmp.lt.u32.totalorder %s2537_s20, %s3216_s7 }
  0x71   : > { %p2540_p8 = pnand %p2538_p4, %p2866_p13 }
  0x73   : > { %p2541_p6 = pneg %p2540_p8 }
  0x75   : > { %p2546_p3 = pnand %p2544_p10, %p2541_p6 }
  0x77   : > { %2549 = shalt.err (!%p2546_p3)
}
  0x78   : > { %s2550_s26 = scalar_lea.vmem %s338_s30, 512  ;;  %p2558_p12 = scmp.lt.s32.totalorder %s338_s30, %s338_s30 }
  0x79   : > { %p2551_p5 = scmp.ne.s32.totalorder %s338_s30, %s2550_s26  ;;  %p2559_p0 = scmp.lt.s32.totalorder %s2550_s26, %s2550_s26 }
  0x7b   : > { %p2553_p7 = pnand %p2551_p5, %p2866_p13  ;;  %p2560_p1 = por %p2559_p0, %p2558_p12 }
  0x7d   : > { %p2554_p9 = pneg %p2553_p7 }
  0x7f   : > { %p2561_p2 = pnand %p2560_p1, %p2554_p9 }
  0x81   : > { %2564 = shalt.err (!%p2561_p2)
}
  0x82   : > { %2319 = dma.hbm_to_vmem [thread:$0]  (!%p2850_p11), %s3216_s7, 512, %s338_s30, [#allocation12], %s3225_s28, %s3225_s28, %s3227_s29  }
  0x83   : > { %s42_s18 = sadd.s32 1, %s2720_s13  ;;  %s51_s22 = sadd.s32 1, %s2712_s11 }
  0x84   : > { %p44_p13 = scmp.ge.s32.totalorder %s42_s18, 2  ;;  %p58_p4 = scmp.ne.s32.totalorder %s2712_s11, %s2708_s10 }
  0x85   : > { %p59_p8 = scmp.eq.s32.totalorder %s2724_s14, 0  ;;  %p2335_p6 = scmp.lt.s32.totalorder %s2724_s14, 2 }
  0x86   : > { %s3272_s18 = smov (%p44_p13, %s42_s18), 0  ;;  %p3245_p3 = scmp.eq.s32.totalorder %s2820_s15, 1 }
  0x87   : > { %p60_p10 = por %p59_p8, %p58_p4  ;;  %s46_s12 = ssub.s32 %s2720_s13, %s3272_s18 }
  0x88   : > { %p2969_p5 = por %p3245_p3, %p58_p4  ;;  %s354_s16 = sand.u32 1, %s2712_s11  }
  0x89   : > { %p49_p7 = scmp.eq.s32.totalorder %s46_s12, 0  ;;  %s2976_s30 = sshll.u32 %s354_s16, 3 }
  0x8a   : > { %s2049_s20 = sshll.u32 %s2720_s13, 8  ;;  %s358_s26 = scalar_lea.vmem [#allocation2], %s2976_s30 }
  0x8b   : > { %s2980_s23 = scalar_select %p49_p7, %s2712_s11, %s51_s22  }
  0x8c   : > { %s2985_s21 = scalar_lea.hbm %s3209_s0, %s2049_s20  ;;  %s367_s24 = sshll.u32 %s358_s26, 4  ;;  %s2994_s24 = int_to_ptr.vmem [resolvable:$true] %s367_s24 }
  0x8d   : > { %p2990_p11 = pnand %p2335_p6, %p60_p10  ;;  %s2999_s25 = scalar_lea.hbm %s3210_s1, %s2049_s20 }
  0x8e   : > { %s3001_s27 = scalar_lea.sflag [#allocation3], %s354_s16  ;;  %s2565_s28 = scalar_lea.hbm %s2985_s21, 128 }
  0x8f   : > { %p2566_p9 = scmp.ne.s32.totalorder %s2985_s21, %s2565_s28  ;;  %p2567_p12 = pneg %p2990_p11 }
  0x90   : > { %s2570_s2 = scalar_lea.hbm %s3209_s0, 512  ;;  %p2571_p2 = scmp.lt.u32.totalorder %s2985_s21, %s3209_s0 }
  0x91   : > { %p2568_p0 = pnand %p2567_p12, %p2566_p9  ;;  %p2572_p13 = scmp.lt.u32.totalorder %s2570_s2, %s2565_s28 }
  0x92   : > { %p2574_p8 = scmp.lt.u32.totalorder %s2565_s28, %s2985_s21 }
  0x93   : > { %p2569_p1 = pneg %p2568_p0  ;;  %p2573_p4 = por %p2572_p13, %p2571_p2 }
  0x95   : > { %p2575_p6 = por %p2574_p8, %p2573_p4 }
  0x97   : > { %p2576_p10 = pnand %p2575_p6, %p2569_p1 }
  0x99   : > { %2579 = shalt.err (!%p2576_p10)
}
  0x9a   : > { %s2580_s16 = scalar_lea.vmem %s2994_s24, 128  ;;  %s2732_s29 = smov [#allocation2]  }
  0x9b   : > { %p2581_p3 = scmp.ne.s32.totalorder %s2994_s24, %s2580_s16  ;;  %s2585_s20 = sshll.u32 %s2732_s29, 4  ;;  %s2586_s20 = int_to_ptr.vmem [resolvable:$false] %s2585_s20 }
  0x9c   : > { %s2587_s3 = scalar_lea.vmem %s2586_s20, 256  ;;  %p2588_p0 = scmp.lt.s32.totalorder %s2994_s24, %s2586_s20 }
  0x9d   : > { %p2583_p7 = pnand %p2581_p3, %p2567_p12  ;;  %p2589_p2 = scmp.lt.s32.totalorder %s2587_s3, %s2580_s16 }
  0x9f   : > { %p2584_p9 = pneg %p2583_p7  ;;  %p2590_p13 = por %p2589_p2, %p2588_p0 }
  0xa1   : > { %p2591_p4 = pnand %p2590_p13, %p2584_p9 }
  0xa3   : > { %2594 = shalt.err (!%p2591_p4)
}
  0xa4   : > { %s3248_s2 = smov 4   ;;  %s3249_s5 = smov 64  }
  0xa5   : > { %2323 = dma.hbm_to_vmem [thread:$0]  (!%p2990_p11), %s2985_s21, 128, %s2994_s24, %s3001_s27, %s3249_s5, %s3249_s5, %s3248_s2  }
  0xa6   : > { %s3033_s28 = scalar_lea.hbm %s2999_s25, 128  ;;  %s381_s22 = scalar_lea.vmem [#allocation5], %s2976_s30 }
  0xa7   : > { %s391_s12 = sshll.u32 %s381_s22, 4  ;;  %s377_s26 = sand.u32 1, %s2724_s14   ;;  %s3036_s12 = int_to_ptr.vmem [resolvable:$true] %s391_s12 }
  0xa8   : > { %s3039_s16 = scalar_lea.sflag [#allocation6], %s377_s26  ;;  %s2625_s29 = scalar_lea.hbm %s2999_s25, 256 }
  0xa9   : > { %p2596_p1 = scmp.ne.s32.totalorder %s3033_s28, %s2625_s29  ;;  %s2600_s24 = scalar_lea.hbm %s3210_s1, 512 }
  0xaa   : > { %p2601_p10 = scmp.lt.u32.totalorder %s3033_s28, %s3210_s1  ;;  %p2602_p3 = scmp.lt.u32.totalorder %s2600_s24, %s2625_s29 }
  0xab   : > { %p2598_p8 = pnand %p2596_p1, %p2567_p12  ;;  %p2604_p9 = scmp.lt.u32.totalorder %s2625_s29, %s3033_s28 }
  0xac   : > { %p2603_p7 = por %p2602_p3, %p2601_p10 }
  0xad   : > { %p2599_p6 = pneg %p2598_p8 }
  0xae   : > { %p2605_p0 = por %p2604_p9, %p2603_p7 }
  0xb0   : > { %p2606_p2 = pnand %p2605_p0, %p2599_p6 }
  0xb2   : > { %2609 = shalt.err (!%p2606_p2)
}
  0xb3   : > { %s2610_s30 = scalar_lea.vmem %s3036_s12, 128  ;;  %s2733_s25 = smov [#allocation5]  }
  0xb4   : > { %p2611_p13 = scmp.ne.s32.totalorder %s3036_s12, %s2610_s30  ;;  %s2615_s22 = sshll.u32 %s2733_s25, 4  ;;  %s2616_s22 = int_to_ptr.vmem [resolvable:$false] %s2615_s22 }
  0xb5   : > { %s2617_s26 = scalar_lea.vmem %s2616_s22, 256  ;;  %p2618_p8 = scmp.lt.s32.totalorder %s3036_s12, %s2616_s22 }
  0xb6   : > { %p2613_p4 = pnand %p2611_p13, %p2567_p12  ;;  %p2619_p10 = scmp.lt.s32.totalorder %s2617_s26, %s2610_s30 }
  0xb8   : > { %p2614_p1 = pneg %p2613_p4  ;;  %p2620_p3 = por %p2619_p10, %p2618_p8 }
  0xba   : > { %p2621_p7 = pnand %p2620_p3, %p2614_p1 }
  0xbc   : > { %2624 = shalt.err (!%p2621_p7)
}
  0xbd   : > { %2326 = dma.hbm_to_vmem [thread:$0]  (!%p2990_p11), %s3033_s28, 128, %s3036_s12, %s3039_s16, %s3249_s5, %s3249_s5, %s3248_s2  }
  0xbe   : > { %p3250_p12 = scmp.ne.s32.totalorder %s3239_s19, 0 }
  0xbf   : > { %s3071_s29 = sand.u32 (!%p3250_p12), 1, %s2708_s10   ;;  %p3251_p6 = scmp.ne.s32.totalorder (!%p3250_p12), %s3236_s17, 0 }
  0xc0   : > { %403 = sbr.rel (%p3250_p12) target bundleno = 2258 (0x8d2), region = 56  ;;  %s1943_s20 = sshll.u32 (!%p3250_p12), %s3071_s29, 3 }
  0xc1   : > { %s406_s21 = scalar_lea.sflag (!%p3250_p12), [#allocation3], %s3071_s29  ;;  %s3075_s24 = scalar_lea.vmem (!%p3250_p12), [#allocation2], %s1943_s20 }
  0xc7   : > { %2679 = dma.done.wait (%p3251_p6), %s406_s21, 128  }
  0xc8   : > { %2681 = vsyncadd (%p3251_p6), %s406_s21, 4294967168  ;;  %s414_s8 = sand.u32 1, %s2820_s15   ;;  %s418_s2 = scalar_lea.vmem [#allocation5], %s1943_s20 }
  0xc9   : > { %s415_s19 = scalar_lea.sflag [#allocation6], %s414_s8 }
  0xca   : > { %2683 = dma.done.wait (%p3251_p6), %s415_s19, 128  }
  0xcb   : > { %2685 = vsyncadd (%p3251_p6), %s415_s19, 4294967168  ;;  %p3252_p11 = scmp.eq.s32.totalorder %s2820_s15, 0 }
  0xcd   : > { %2687 = dma.done.wait (%p3252_p11), [#allocation6], 2048   ;;  %p3253_p9 = pmov %p3252_p11 }
  0xcf   : > { %2689 = vsyncadd (%p3253_p9), [#allocation6], 4294965248  ;;  %p3254_p0 = pmov %p3253_p9 }
  0xd1   : > { %2691 = dma.done.wait (%p3254_p0), [#allocation9], 4096   ;;  %p3255_p2 = pmov %p3254_p0 }
  0xd2   : > { %p3256_p13 = pmov %p3254_p0 }
  0xd3   : > { %2693 = vsyncadd (%p3255_p2), [#allocation9], 4294963200 }
  0xd4   : > { %2695 = dma.done.wait (%p3256_p13), [#allocation12], 512   ;;  %p3257_p4 = pmov %p3254_p0 }
  0xd5   : > { %v2399_v0 = vld [vmem:[#allocation8] sm:$0xff]   ;;  %v2401_v2 = vld [vmem:[#allocation8 + $0x8] sm:$0xff]   ;;  %v2403_v4 = vld [vmem:[#allocation8 + $0x10] sm:$0xff]   ;;  %vm537_vm0 = vcmask 523264   ;;  %vm509_vm1 = vcmask 1043456   ;;  %vm803_vm2 = vcmask 1045504  }
  0xd6   : > { %2697 = vsyncadd (%p3257_p4), [#allocation12], 4294966784  ;;  %v2400_v1 = vld [vmem:[#allocation7] sm:$0xff]   ;;  %2129 = vmatprep.subr.bf16.mxu0 %v2399_v0  ;;  %v2402_v3 = vld [vmem:[#allocation7 + $0x8] sm:$0xff]   ;;  %vm1099_vm3 = vcmask 1046528   ;;  %vm2735_vm5 = vmmov 0  }
  0xd7   : > { %2141 = vmatprep.subr.bf16.mxu1 %v2400_v1  ;;  %2130 = vmatpush3.bf16.msra.mxu0 %v2399_v0  ;;  %v2404_v5 = vld [vmem:[#allocation7 + $0x10] sm:$0xff]   ;;  %v2405_v6 = vld [vmem:[#allocation8 + $0x18] sm:$0xff]   ;;  %v2407_v8 = vld [vmem:[%s3075_s24] sm:$0xff]   ;;  %vm1393_vm4 = vsmask.f32 7424  ;;  %s3258_s19 = sld [smem:[#allocation21_spill]] }
  0xd8   : > { %2142 = vmatpush3.bf16.msra.mxu1 %v2400_v1  ;;  %2131 = vmatprep.subr.bf16.mxu0 %v2401_v2  ;;  %v2406_v7 = vld [vmem:[#allocation7 + $0x18] sm:$0xff]   ;;  %v2409_v10 = vld [vmem:[#allocation10] sm:$0xff]   ;;  %v510_v11 = vrot.slane %v2407_v8, 4  ;;  %v2410_v14 = vld [vmem:[#allocation10 + $0x8] sm:$0xff]   ;;  %s3259_s5 = sld [smem:[#allocation26_spill]]  ;;  %s3260_s30 = sld [smem:[#allocation27_spill]] }
  0xd9   : > { %2143 = vmatprep.subr.bf16.mxu1 %v2402_v3  ;;  %v2408_v9 = vld [vmem:[%s418_s2] sm:$0xff]   ;;  %2149 = vmatprep.mubr.msk.bf16.mxu1 %vm537_vm0, %v2407_v8  ;;  %v2413_v17 = vld [vmem:[#allocation7 + $0x20] sm:$0xff]   ;;  %v2415_v39 = vld [vmem:[#allocation7 + $0x28] sm:$0xff]   ;;  %s1949_s2 = sshll.u32 %s3071_s29, 4  ;;  %s1761_s26 = scalar_lea.sflag [#allocation4], %s3071_s29 }
  0xda   : > { %v511_v12 = vrot.slane %v2408_v9, 4  ;;  %v2411_v15 = vld [vmem:[#allocation10 + $0x10] sm:$0xff]   ;;  %v2412_v16 = vld [vmem:[#allocation10 + $0x18] sm:$0xff]   ;;  %v2414_v18 = vld [vmem:[#allocation8 + $0x20] sm:$0xff]   ;;  %s473_s28 = scalar_lea.vmem [#allocation13], %s1949_s2  ;;  %s2736_s21 = smov [#allocation13]  }
  0xdb   : > { %2132 = vmatpush3.bf16.msra.mxu0 %v2401_v2  ;;  %v1964_v21 = vld [vmem:[%s3213_s4] ss:$0 sm:$0xff]  ;;  %v2416_v40 = vld [vmem:[#allocation8 + $0x28] sm:$0xff]   ;;  %v2417_v41 = vld [vmem:[#allocation7 + $0x30] sm:$0xff]   ;;  %s1776_s12 = sshll.u32 %s473_s28, 4  ;;  %s2630_s24 = sshll.u32 %s2736_s21, 4  ;;  %s3153_s12 = int_to_ptr.vmem [resolvable:$true] %s1776_s12  ;;  %s2631_s24 = int_to_ptr.vmem [resolvable:$false] %s2630_s24 }
  0xdc   : > { %2144 = vmatpush3.bf16.msra.mxu1 %v2402_v3  ;;  %2133 = vmatprep.subr.bf16.mxu0 %v2403_v4  ;;  %v512_v13 = vsel %vm509_vm1, %v510_v11, %v511_v12  ;;  %v2418_v42 = vld [vmem:[#allocation8 + $0x30] sm:$0xff]   ;;  %v2419_v43 = vld [vmem:[#allocation7 + $0x38] sm:$0xff]   ;;  %v1965_v45 = vld [vmem:[%s3215_s6] ss:$0 sm:$0xff]  ;;  %s2626_s20 = scalar_lea.vmem %s3153_s12, 256  ;;  %s2632_s8 = scalar_lea.vmem %s2631_s24, 512 }
  0xdd   : > { %2145 = vmatprep.subr.bf16.mxu1 %v2404_v5  ;;  %2137 = vmatprep.mubr.msk.bf16.mxu0 %vm537_vm0, %v512_v13  ;;  %v2420_v44 = vld [vmem:[#allocation8 + $0x38] sm:$0xff]   ;;  %v2421_v61 = vld [vmem:[#allocation10 + $0x20] sm:$0xff]   ;;  %v2422_v62 = vld [vmem:[#allocation10 + $0x28] sm:$0xff]   ;;  %s2051_s16 = sshll.u32 %s3258_s19, 8  ;;  %p2627_p1 = scmp.ne.s32.totalorder %s3153_s12, %s2626_s20 }
  0xde   : > { %v2423_v63 = vld [vmem:[#allocation10 + $0x30] sm:$0xff]   ;;  %v2424_v0 = vld [vmem:[#allocation10 + $0x38] sm:$0xff]   ;;  %v2425_v1 = vld [vmem:[#allocation7 + $0x40] sm:$0xff]   ;;  %s3261_s25 = smov %s3260_s30  ;;  %s3158_s22 = scalar_lea.hbm %s3260_s30, %s2051_s16 }
  0xdf   : > { %2134 = vmatpush3.bf16.msra.mxu0 %v2403_v4  ;;  %v2426_v2 = vld [vmem:[#allocation8 + $0x40] sm:$0xff]   ;;  %p2628_p8 = pnand %p2627_p1, %p2969_p5  ;;  %p2633_p3 = scmp.lt.s32.totalorder %s3153_s12, %s2631_s24 }
  0xe0   : > { %2146 = vmatpush3.bf16.msra.mxu1 %v2404_v5  ;;  %2135 = vmatprep.subr.bf16.mxu0 %v2405_v6  ;;  %p2634_p7 = scmp.lt.s32.totalorder %s2632_s8, %s2626_s20 }
  0xe1   : > { %2147 = vmatprep.subr.bf16.mxu1 %v2406_v7  ;;  %p2629_p10 = pneg %p2628_p8 }
  0xe2   : > { %p2635_p12 = por %p2634_p7, %p2633_p3 }
  0xe3   : > { %2136 = vmatpush3.bf16.msra.mxu0 %v2405_v6 }
  0xe4   : > { %2148 = vmatpush3.bf16.msra.mxu1 %v2406_v7  ;;  %2153 = vmatprep.subr.bf16.mxu0 %v2409_v10  ;;  %v1985_v7 = vld [vmem:[%s3213_s4 + $0x1] ss:$0 sm:$0xff]  ;;  %p2636_p6 = pnand %p2635_p12, %p2629_p10 }
  0xe5   : > { %2165 = vmatprep.subr.bf16.mxu1 %v2414_v18 }
  0xe6   : > { %2138 = vmatmul.mubr.msk.bf16.vlgmr.msra.gmra.mrb[0].mxu0 %vm537_vm0, %v511_v12 }
  0xe7   : > { %2150 = vmatmul.mubr.msk.bf16.vlgmr.msra.gmra.mrb[0].mxu1 %vm537_vm0, %v2408_v9  ;;  %2154 = vmatpush3.bf16.msra.mxu0 %v2409_v10 }
  0xe8   : > { %2155 = vmatprep.subr.bf16.mxu0 %v2410_v14  ;;  %2166 = vmatpush3.bf16.msra.mxu1 %v2414_v18 }
  0xe9   : > { %2167 = vmatprep.subr.bf16.mxu1 %v2416_v40 }
  0xeb   : > { %2156 = vmatpush3.bf16.msra.mxu0 %v2410_v14 }
  0xec   : > { %2157 = vmatprep.subr.bf16.mxu0 %v2411_v15  ;;  %2168 = vmatpush3.bf16.msra.mxu1 %v2416_v40 }
  0xed   : > { %2169 = vmatprep.subr.bf16.mxu1 %v2418_v42 }
  0xef   : > { %2158 = vmatpush3.bf16.msra.mxu0 %v2411_v15 }
  0xf0   : > { %2159 = vmatprep.subr.bf16.mxu0 %v2412_v16  ;;  %2170 = vmatpush3.bf16.msra.mxu1 %v2418_v42 }
  0xf1   : > { %2171 = vmatprep.subr.bf16.mxu1 %v2420_v44 }
  0xf3   : > { %2160 = vmatpush3.bf16.msra.mxu0 %v2412_v16 }
  0xf4   : > { %2177 = vmatprep.subr.bf16.mxu0 %v2413_v17  ;;  %2172 = vmatpush3.bf16.msra.mxu1 %v2420_v44 }
  0xf5   : > { %2189 = vmatprep.subr.bf16.mxu1 %v2421_v61 }
 0x1b9   : > { %v2139_v19 = vpop.f32.mrb[0].mxu0 }
 0x1ba   : > { %v2151_v20 = vpop.f32.mrb[0].mxu1  ;;  %v578_v22 = vpop.f32.mrb[1].mxu0 }
 0x1bb   : > { %v665_v23 = vadd.f32 %v2151_v20, %v2139_v19  ;;  %v656_v24 = vpop.f32.mrb[1].mxu1  ;;  %v2140_v25 = vpop.f32.mrb[2].mxu0 }
 0x1bc   : > { %v657_v26 = vadd.f32 %v656_v24, %v578_v22  ;;  %v2152_v27 = vpop.f32.mrb[2].mxu1  ;;  %v581_v28 = vpop.f32.mrb[3].mxu0  ;;  %v2428_v24 = vld [vmem:[#allocation8 + $0x48] sm:$0xff]   ;;  %v2429_v25 = vld [vmem:[#allocation7 + $0x50] sm:$0xff]  }
 0x1bd   : > { %v679_v29 = vadd.f32 %v1964_v21, %v665_v23  ;;  %v659_v30 = vpop.f32.mrb[3].mxu1  ;;  %v2427_v23 = vld [vmem:[#allocation7 + $0x48] sm:$0xff]   ;;  %v2431_v27 = vld [vmem:[#allocation7 + $0x58] sm:$0xff]  }
 0x1be   : > { %v677_v31 = vadd.f32 %v1964_v21, %v657_v26  ;;  %v660_v32 = vadd.f32 %v659_v30, %v581_v28  ;;  %v2430_v26 = vld [vmem:[#allocation8 + $0x50] sm:$0xff]   ;;  %v2432_v28 = vld [vmem:[#allocation8 + $0x58] sm:$0xff]  }
 0x1bf   : > { %v682_v34 = vmax.f32 %v679_v29, 0.0  ;;  %v1987_v29 = vld [vmem:[%s3215_s6 + $0x1] ss:$0 sm:$0xff] }
 0x1c0   : > { %v678_v33 = vadd.f32 %v1964_v21, %v660_v32  ;;  %v680_v35 = vmax.f32 %v677_v31, 0.0 }
 0x1c1   : > { %v684_v38 = vpack.c.bf16 %v682_v34, %v682_v34 }
 0x1c2   : > { %v681_v36 = vmax.f32 %v678_v33, 0.0 }
 0x1c4   : > { %v683_v37 = vpack.c.bf16 %v681_v36, %v680_v35 }
 0x1c6   : > { %2161 = vmatprep.mubr.msk.bf16.mxu0 %vm537_vm0, %v683_v37 }
 0x1c7   : > { %2162 = vmatmul.mubr.msk.bf16.vlgmr.msra.gmra.mrb[4].mxu0 %vm537_vm0, %v684_v38 }
 0x1c8   : > { %2178 = vmatpush3.bf16.msra.mxu0 %v2413_v17 }
 0x1c9   : > { %2179 = vmatprep.subr.bf16.mxu0 %v2415_v39 }
 0x1cc   : > { %2180 = vmatpush3.bf16.msra.mxu0 %v2415_v39 }
 0x1cd   : > { %2181 = vmatprep.subr.bf16.mxu0 %v2417_v41 }
 0x1d0   : > { %2182 = vmatpush3.bf16.msra.mxu0 %v2417_v41 }
 0x1d1   : > { %2183 = vmatprep.subr.bf16.mxu0 %v2419_v43 }
 0x1d4   : > { %2184 = vmatpush3.bf16.msra.mxu0 %v2419_v43 }
 0x1d5   : > { %2201 = vmatprep.subr.bf16.mxu0 %v2426_v2 }
 0x29a   : > { %v2163_v46 = vpop.f32.mrb[4].mxu0 }
 0x29b   : > { %v773_v47 = vadd.f32 %v2163_v46, %v1965_v45  ;;  %v764_v48 = vpop.f32.mrb[5].mxu0  ;;  %v2434_v46 = vld [vmem:[#allocation10 + $0x48] sm:$0xff]  }
 0x29c   : > { %v765_v49 = vadd.f32 %v1965_v45, %v764_v48  ;;  %v2164_v50 = vpop.f32.mrb[6].mxu0  ;;  %v2436_v48 = vld [vmem:[#allocation10 + $0x58] sm:$0xff]  }
 0x29d   : > { %v780_v51 = vmax.f32 %v773_v47, 0.0  ;;  %v767_v52 = vpop.f32.mrb[7].mxu0  ;;  %v2435_v47 = vld [vmem:[#allocation10 + $0x50] sm:$0xff]  }
 0x29e   : > { %v768_v53 = vadd.f32 %v1965_v45, %v767_v52  ;;  %v778_v55 = vmax.f32 %v765_v49, 0.0  ;;  %v2433_v45 = vld [vmem:[#allocation10 + $0x40] sm:$0xff]  }
 0x29f   : > { %v782_v54 = vpack.c.bf16 %v780_v51, %v780_v51  ;;  %v2437_v49 = vld [vmem:[#allocation7 + $0x60] sm:$0xff]  }
 0x2a0   : > { %v779_v56 = vmax.f32 %v768_v53, 0.0 }
 0x2a1   : > { %v805_v58 = vrot.slane %v782_v54, 2 }
 0x2a2   : > { %v781_v57 = vpack.c.bf16 %v779_v56, %v778_v55 }
 0x2a4   : > { %v804_v59 = vrot.slane %v781_v57, 2  ;;  %2185 = vmatprep.mubr.msk.bf16.mxu0 %vm537_vm0, %v781_v57 }
 0x2a5   : > { %2186 = vmatmul.mubr.msk.bf16.vlgmr.msra.gmra.mrb[8].mxu0 %vm537_vm0, %v782_v54  ;;  %v2007_v54 = vld [vmem:[%s3213_s4 + $0x2] ss:$0 sm:$0xff] }
 0x2a6   : > { %v806_v60 = vsel %vm803_vm2, %v804_v59, %v805_v58  ;;  %2202 = vmatpush3.bf16.msra.mxu0 %v2426_v2 }
 0x2a7   : > { %2173 = vmatprep.mubr.msk.bf16.mxu1 %vm537_vm0, %v806_v60  ;;  %2203 = vmatprep.subr.bf16.mxu0 %v2428_v24 }
 0x2a8   : > { %2174 = vmatmul.mubr.msk.bf16.vlgmr.msra.gmra.mrb[4].mxu1 %vm537_vm0, %v805_v58 }
 0x2a9   : > { %2190 = vmatpush3.bf16.msra.mxu1 %v2421_v61 }
 0x2aa   : > { %2191 = vmatprep.subr.bf16.mxu1 %v2422_v62  ;;  %2204 = vmatpush3.bf16.msra.mxu0 %v2428_v24 }
 0x2ab   : > { %2205 = vmatprep.subr.bf16.mxu0 %v2430_v26 }
 0x2ad   : > { %2192 = vmatpush3.bf16.msra.mxu1 %v2422_v62 }
 0x2ae   : > { %2193 = vmatprep.subr.bf16.mxu1 %v2423_v63  ;;  %2206 = vmatpush3.bf16.msra.mxu0 %v2430_v26 }
 0x2af   : > { %2207 = vmatprep.subr.bf16.mxu0 %v2432_v28 }
 0x2b1   : > { %2194 = vmatpush3.bf16.msra.mxu1 %v2423_v63 }
 0x2b2   : > { %2195 = vmatprep.subr.bf16.mxu1 %v2424_v0  ;;  %2208 = vmatpush3.bf16.msra.mxu0 %v2432_v28 }
 0x2b3   : > { %2225 = vmatprep.subr.bf16.mxu0 %v2433_v45 }
 0x2b5   : > { %2196 = vmatpush3.bf16.msra.mxu1 %v2424_v0 }
 0x2b6   : > { %2213 = vmatprep.subr.bf16.mxu1 %v2425_v1 }
 0x378   : > { %v2187_v3 = vpop.f32.mrb[8].mxu0 }
 0x379   : > { %v949_v4 = vpop.f32.mrb[9].mxu0 }
 0x37a   : > { %v2188_v5 = vpop.f32.mrb[10].mxu0 }
 0x37b   : > { %v2175_v6 = vpop.f32.mrb[4].mxu1  ;;  %v952_v8 = vpop.f32.mrb[11].mxu0 }
 0x37c   : > { %v958_v9 = vadd.f32 %v2187_v3, %v2175_v6  ;;  %v871_v10 = vpop.f32.mrb[5].mxu1  ;;  %v2438_v6 = vld [vmem:[#allocation7 + $0x68] sm:$0xff]  }
 0x37d   : > { %v950_v11 = vadd.f32 %v949_v4, %v871_v10  ;;  %v2176_v12 = vpop.f32.mrb[6].mxu1  ;;  %v2442_v10 = vld [vmem:[#allocation7 + $0x78] sm:$0xff]  }
 0x37e   : > { %v973_v13 = vadd.f32 %v1985_v7, %v958_v9  ;;  %v874_v14 = vpop.f32.mrb[7].mxu1  ;;  %v2441_v9 = vld [vmem:[#allocation8 + $0x68] sm:$0xff]   ;;  %v2444_v12 = vld [vmem:[#allocation8 + $0x78] sm:$0xff]  }
 0x37f   : > { %v971_v15 = vadd.f32 %v1985_v7, %v950_v11  ;;  %v953_v16 = vadd.f32 %v952_v8, %v874_v14  ;;  %v2440_v8 = vld [vmem:[#allocation7 + $0x70] sm:$0xff]  }
 0x380   : > { %v976_v18 = vmax.f32 %v973_v13, 0.0  ;;  %v2443_v11 = vld [vmem:[#allocation8 + $0x70] sm:$0xff]   ;;  %v2009_v13 = vld [vmem:[%s3215_s6 + $0x2] ss:$0 sm:$0xff] }
 0x381   : > { %v972_v17 = vadd.f32 %v1985_v7, %v953_v16  ;;  %v974_v19 = vmax.f32 %v971_v15, 0.0  ;;  %v2439_v7 = vld [vmem:[#allocation8 + $0x60] sm:$0xff]  }
 0x382   : > { %v978_v22 = vpack.c.bf16 %v976_v18, %v976_v18 }
 0x383   : > { %v975_v20 = vmax.f32 %v972_v17, 0.0 }
 0x385   : > { %v977_v21 = vpack.c.bf16 %v975_v20, %v974_v19 }
 0x387   : > { %2197 = vmatprep.mubr.msk.bf16.mxu1 %vm537_vm0, %v977_v21 }
 0x388   : > { %2198 = vmatmul.mubr.msk.bf16.vlgmr.msra.gmra.mrb[8].mxu1 %vm537_vm0, %v978_v22 }
 0x389   : > { %2214 = vmatpush3.bf16.msra.mxu1 %v2425_v1 }
 0x38a   : > { %2215 = vmatprep.subr.bf16.mxu1 %v2427_v23 }
 0x38d   : > { %2216 = vmatpush3.bf16.msra.mxu1 %v2427_v23 }
 0x38e   : > { %2217 = vmatprep.subr.bf16.mxu1 %v2429_v25 }
 0x391   : > { %2218 = vmatpush3.bf16.msra.mxu1 %v2429_v25 }
 0x392   : > { %2219 = vmatprep.subr.bf16.mxu1 %v2431_v27 }
 0x395   : > { %2220 = vmatpush3.bf16.msra.mxu1 %v2431_v27 }
 0x396   : > { %2237 = vmatprep.subr.bf16.mxu1 %v2439_v7 }
 0x45b   : > { %v2199_v30 = vpop.f32.mrb[8].mxu1 }
 0x45c   : > { %v1069_v31 = vadd.f32 %v2199_v30, %v1987_v29  ;;  %v1060_v32 = vpop.f32.mrb[9].mxu1 }
 0x45d   : > { %v1061_v33 = vadd.f32 %v1987_v29, %v1060_v32  ;;  %v2200_v34 = vpop.f32.mrb[10].mxu1 }
 0x45e   : > { %v1076_v35 = vmax.f32 %v1069_v31, 0.0  ;;  %v1063_v36 = vpop.f32.mrb[11].mxu1  ;;  %v2445_v34 = vld [vmem:[#allocation10 + $0x60] sm:$0xff]  }
 0x45f   : > { %v1064_v37 = vadd.f32 %v1987_v29, %v1063_v36  ;;  %v1074_v39 = vmax.f32 %v1061_v33, 0.0  ;;  %v2447_v36 = vld [vmem:[#allocation10 + $0x70] sm:$0xff]  }
 0x460   : > { %v1078_v38 = vpack.c.bf16 %v1076_v35, %v1076_v35  ;;  %v2446_v35 = vld [vmem:[#allocation10 + $0x68] sm:$0xff]  }
 0x461   : > { %v1075_v40 = vmax.f32 %v1064_v37, 0.0  ;;  %v2448_v37 = vld [vmem:[#allocation10 + $0x78] sm:$0xff]  }
 0x462   : > { %v1101_v42 = vrot.slane %v1078_v38, 1 }
 0x463   : > { %v1077_v41 = vpack.c.bf16 %v1075_v40, %v1074_v39  ;;  %v2734_v39 = vmov 0.0   ;;  %v2450_v40 = vld [vmem:[#allocation11 + $0x8] sm:$0xff]  }
 0x465   : > { %v1100_v43 = vrot.slane %v1077_v41, 1  ;;  %2221 = vmatprep.mubr.msk.bf16.mxu1 %vm537_vm0, %v1077_v41 }
 0x466   : > { %2222 = vmatmul.mubr.msk.bf16.vlgmr.msra.gmra.mrb[12].mxu1 %vm537_vm0, %v1078_v38  ;;  %v2449_v38 = vld [vmem:[#allocation11] sm:$0xff]  }
 0x467   : > { %v1102_v44 = vsel %vm1099_vm3, %v1100_v43, %v1101_v42  ;;  %2238 = vmatpush3.bf16.msra.mxu1 %v2439_v7 }
 0x468   : > { %2209 = vmatprep.mubr.msk.bf16.mxu0 %vm537_vm0, %v1102_v44  ;;  %2239 = vmatprep.subr.bf16.mxu1 %v2441_v9 }
 0x469   : > { %2210 = vmatmul.mubr.msk.bf16.vlgmr.msra.gmra.mrb[12].mxu0 %vm537_vm0, %v1101_v42 }
 0x46a   : > { %2226 = vmatpush3.bf16.msra.mxu0 %v2433_v45 }
 0x46b   : > { %2227 = vmatprep.subr.bf16.mxu0 %v2434_v46  ;;  %2240 = vmatpush3.bf16.msra.mxu1 %v2441_v9  ;;  %v2038_v9 = vld [vmem:[%s3259_s5] ss:$0 sm:$0xff] }
 0x46c   : > { %2241 = vmatprep.subr.bf16.mxu1 %v2443_v11 }
 0x46e   : > { %2228 = vmatpush3.bf16.msra.mxu0 %v2434_v46  ;;  %v2029_v46 = vld [vmem:[%s3213_s4 + $0x3] ss:$0 sm:$0xff] }
 0x46f   : > { %2229 = vmatprep.subr.bf16.mxu0 %v2435_v47  ;;  %2242 = vmatpush3.bf16.msra.mxu1 %v2443_v11 }
 0x470   : > { %2243 = vmatprep.subr.bf16.mxu1 %v2444_v12 }
 0x472   : > { %2230 = vmatpush3.bf16.msra.mxu0 %v2435_v47 }
 0x473   : > { %2231 = vmatprep.subr.bf16.mxu0 %v2436_v48  ;;  %2244 = vmatpush3.bf16.msra.mxu1 %v2444_v12 }
 0x474   : > { %2261 = vmatprep.subr.bf16.mxu1 %v2445_v34 }
 0x476   : > { %2232 = vmatpush3.bf16.msra.mxu0 %v2436_v48 }
 0x477   : > { %2249 = vmatprep.subr.bf16.mxu0 %v2437_v49 }
 0x539   : > { %v2223_v50 = vpop.f32.mrb[12].mxu1 }
 0x53a   : > { %v1245_v51 = vpop.f32.mrb[13].mxu1 }
 0x53b   : > { %v2224_v52 = vpop.f32.mrb[14].mxu1 }
 0x53c   : > { %v2211_v53 = vpop.f32.mrb[12].mxu0  ;;  %v1248_v55 = vpop.f32.mrb[15].mxu1 }
 0x53d   : > { %v1254_v56 = vadd.f32 %v2223_v50, %v2211_v53  ;;  %v1167_v57 = vpop.f32.mrb[13].mxu0 }
 0x53e   : > { %v1246_v58 = vadd.f32 %v1245_v51, %v1167_v57  ;;  %v2212_v59 = vpop.f32.mrb[14].mxu0 }
 0x53f   : > { %v1269_v60 = vadd.f32 %v2007_v54, %v1254_v56  ;;  %v1170_v61 = vpop.f32.mrb[15].mxu0 }
 0x540   : > { %v1267_v62 = vadd.f32 %v2007_v54, %v1246_v58  ;;  %v1249_v63 = vadd.f32 %v1248_v55, %v1170_v61  ;;  %v2451_v61 = vld [vmem:[#allocation11 + $0x10] sm:$0xff]  }
 0x541   : > { %v1272_v1 = vmax.f32 %v1269_v60, 0.0 }
 0x542   : > { %v1268_v0 = vadd.f32 %v2007_v54, %v1249_v63  ;;  %v1270_v2 = vmax.f32 %v1267_v62, 0.0  ;;  %v2452_v62 = vld [vmem:[#allocation11 + $0x18] sm:$0xff]   ;;  %v2031_v63 = vld [vmem:[%s3215_s6 + $0x3] ss:$0 sm:$0xff] }
 0x543   : > { %v1274_v5 = vpack.c.bf16 %v1272_v1, %v1272_v1 }
 0x544   : > { %v1271_v3 = vmax.f32 %v1268_v0, 0.0 }
 0x546   : > { %v1273_v4 = vpack.c.bf16 %v1271_v3, %v1270_v2 }
 0x548   : > { %2233 = vmatprep.mubr.msk.bf16.mxu0 %vm537_vm0, %v1273_v4 }
 0x549   : > { %2234 = vmatmul.mubr.msk.bf16.vlgmr.msra.gmra.mrb[16].mxu0 %vm537_vm0, %v1274_v5 }
 0x54a   : > { %2250 = vmatpush3.bf16.msra.mxu0 %v2437_v49 }
 0x54b   : > { %2251 = vmatprep.subr.bf16.mxu0 %v2438_v6 }
 0x54e   : > { %2252 = vmatpush3.bf16.msra.mxu0 %v2438_v6 }
 0x54f   : > { %2253 = vmatprep.subr.bf16.mxu0 %v2440_v8 }
 0x552   : > { %2254 = vmatpush3.bf16.msra.mxu0 %v2440_v8 }
 0x553   : > { %2255 = vmatprep.subr.bf16.mxu0 %v2442_v10 }
 0x556   : > { %2256 = vmatpush3.bf16.msra.mxu0 %v2442_v10 }
 0x557   : > { %2273 = vmatprep.subr.bf16.mxu0 %v2734_v39 }
 0x61c   : > { %v2235_v14 = vpop.f32.mrb[16].mxu0 }
 0x61d   : > { %v1365_v15 = vadd.f32 %v2235_v14, %v2009_v13  ;;  %v1356_v16 = vpop.f32.mrb[17].mxu0 }
 0x61e   : > { %v1357_v17 = vadd.f32 %v2009_v13, %v1356_v16  ;;  %v2236_v18 = vpop.f32.mrb[18].mxu0 }
 0x61f   : > { %v1372_v19 = vmax.f32 %v1365_v15, 0.0  ;;  %v1359_v20 = vpop.f32.mrb[19].mxu0 }
 0x620   : > { %v1360_v21 = vadd.f32 %v2009_v13, %v1359_v20  ;;  %v1370_v23 = vmax.f32 %v1357_v17, 0.0 }
 0x621   : > { %v1374_v22 = vpack.c.bf16 %v1372_v19, %v1372_v19 }
 0x622   : > { %v1371_v24 = vmax.f32 %v1360_v21, 0.0 }
 0x623   : > { %v1402_v26 = vshll.u32 %v1374_v22, 16  ;;  %v1406_v32 = vshrl.u32 %v1374_v22, 16 }
 0x624   : > { %v1373_v25 = vpack.c.bf16 %v1371_v24, %v1370_v23 }
 0x625   : > { %v1404_v30 = vrot.slane %v1402_v26, 1 }
 0x626   : > { %v1397_v27 = vshll.u32 %v1373_v25, 16  ;;  %2257 = vmatprep.mubr.msk.bf16.mxu0 %vm537_vm0, %v1373_v25  ;;  %v1395_v28 = vshrl.u32 %v1373_v25, 16 }
 0x627   : > { %2258 = vmatmul.mubr.msk.bf16.vlgmr.msra.gmra.mrb[20].mxu0 %vm537_vm0, %v1374_v22 }
 0x628   : > { %v1399_v29 = vrot.slane %v1397_v27, 1  ;;  %2274 = vmatpush3.bf16.msra.mxu0 %v2449_v38  ;;  %2281 = vmatprep.mubr.msk.bf16.mxu0 %vm2735_vm5, %v2734_v39 }
 0x629   : > { %2275 = vmatprep.subr.bf16.mxu0 %v2734_v39 }
 0x62a   : > { %v1400_v31 = vor.u32 %v1399_v29, %v1395_v28 }
 0x62c   : > { %v1405_v33 = vsel %vm1393_vm4, %v1400_v31, %v1404_v30  ;;  %2276 = vmatpush3.bf16.msra.mxu0 %v2450_v40 }
 0x62d   : > { %2245 = vmatprep.mubr.msk.bf16.mxu1 %vm537_vm0, %v1405_v33  ;;  %2277 = vmatprep.subr.bf16.mxu0 %v2734_v39 }
 0x62e   : > { %2246 = vmatmul.mubr.msk.bf16.vlgmr.msra.gmra.mrb[16].mxu1 %vm537_vm0, %v1406_v32 }
 0x62f   : > { %2262 = vmatpush3.bf16.msra.mxu1 %v2445_v34 }
 0x630   : > { %2263 = vmatprep.subr.bf16.mxu1 %v2446_v35  ;;  %2278 = vmatpush3.bf16.msra.mxu0 %v2451_v61 }
 0x631   : > { %2279 = vmatprep.subr.bf16.mxu0 %v2734_v39 }
 0x633   : > { %2264 = vmatpush3.bf16.msra.mxu1 %v2446_v35 }
 0x634   : > { %2265 = vmatprep.subr.bf16.mxu1 %v2447_v36  ;;  %2280 = vmatpush3.bf16.msra.mxu0 %v2452_v62 }
 0x637   : > { %2266 = vmatpush3.bf16.msra.mxu1 %v2447_v36 }
 0x638   : > { %2267 = vmatprep.subr.bf16.mxu1 %v2448_v37 }
 0x63b   : > { %2268 = vmatpush3.bf16.msra.mxu1 %v2448_v37 }
 0x6fa   : > { %v2259_v41 = vpop.f32.mrb[20].mxu0 }
 0x6fb   : > { %v1548_v42 = vpop.f32.mrb[21].mxu0 }
 0x6fc   : > { %v2260_v43 = vpop.f32.mrb[22].mxu0 }
 0x6fd   : > { %v1551_v44 = vpop.f32.mrb[23].mxu0 }
 0x701   : > { %v2247_v45 = vpop.f32.mrb[16].mxu1 }
 0x702   : > { %v1557_v47 = vadd.f32 %v2259_v41, %v2247_v45  ;;  %v1472_v48 = vpop.f32.mrb[17].mxu1 }
 0x703   : > { %v1549_v49 = vadd.f32 %v1548_v42, %v1472_v48  ;;  %v2248_v50 = vpop.f32.mrb[18].mxu1 }
 0x704   : > { %v1572_v51 = vadd.f32 %v2029_v46, %v1557_v47  ;;  %v1475_v52 = vpop.f32.mrb[19].mxu1 }
 0x705   : > { %v1570_v53 = vadd.f32 %v2029_v46, %v1549_v49  ;;  %v1552_v54 = vadd.f32 %v1551_v44, %v1475_v52 }
 0x706   : > { %v1575_v56 = vmax.f32 %v1572_v51, 0.0 }
 0x707   : > { %v1571_v55 = vadd.f32 %v2029_v46, %v1552_v54  ;;  %v1573_v57 = vmax.f32 %v1570_v53, 0.0 }
 0x708   : > { %v1577_v60 = vpack.c.bf16 %v1575_v56, %v1575_v56 }
 0x709   : > { %v1574_v58 = vmax.f32 %v1571_v55, 0.0 }
 0x70b   : > { %v1576_v59 = vpack.c.bf16 %v1574_v58, %v1573_v57 }
 0x70d   : > { %2269 = vmatprep.mubr.msk.bf16.mxu1 %vm537_vm0, %v1576_v59 }
 0x70e   : > { %2270 = vmatmul.mubr.msk.bf16.vlgmr.msra.gmra.mrb[20].mxu1 %vm537_vm0, %v1577_v60 }
 0x7e1   : > { %v2271_v0 = vpop.f32.mrb[20].mxu1 }
 0x7e2   : > { %v1659_v1 = vpop.f32.mrb[21].mxu1 }
 0x7e3   : > { %v1660_v2 = vadd.f32 %v2031_v63, %v1659_v1  ;;  %v2272_v3 = vpop.f32.mrb[22].mxu1 }
 0x7e4   : > { %v1662_v4 = vpop.f32.mrb[23].mxu1 }
 0x7e5   : > { %v1663_v5 = vadd.f32 %v2031_v63, %v1662_v4  ;;  %v1672_v6 = vmax.f32 %v1660_v2, 0.0 }
 0x7e7   : > { %v1673_v7 = vmax.f32 %v1663_v5, 0.0 }
 0x7e9   : > { %v1674_v8 = vpack.c.bf16 %v1673_v7, %v1672_v6 }
 0x7eb   : > { %2282 = vmatmul.mubr.msk.bf16.vlgmr.msra.gmra.mrb[24].mxu0 %vm537_vm0, %v1674_v8 }
 0x8be   : > { %v1751_v10 = vpop.f32.mrb[24].mxu0 }
 0x8bf   : > { %v1752_v11 = vadd.f32 %v2038_v9, %v1751_v10  ;;  %v2283_v12 = vpop.f32.mrb[25].mxu0 }
 0x8c0   : > { %v1754_v13 = vpop.f32.mrb[26].mxu0 }
 0x8c1   : > { %1758 = vst.msk [vmem:[%s473_s28] sm:$0xff] %vm537_vm0, %v1752_v11  ;;  %v1755_v14 = vadd.f32 %v2038_v9, %v1754_v13  ;;  %v2284_v15 = vpop.f32.mrb[27].mxu0 }
 0x8c3   : > { %1759 = vst.msk [vmem:[%s473_s28 + $0x8] sm:$0xff] %vm537_vm0, %v1755_v14 }
 0x8c4   : > { %2639 = shalt.err (!%p2636_p6)
}
 0x8c5   : > { %s2640_s19 = scalar_lea.hbm %s3158_s22, 256  ;;  %s2644_s17 = scalar_lea.hbm %s3261_s25, 512 }
 0x8c6   : > { %p2641_p11 = scmp.ne.s32.totalorder %s3158_s22, %s2640_s19  ;;  %p2645_p2 = scmp.lt.u32.totalorder %s3158_s22, %s3261_s25 }
 0x8c7   : > { %p2646_p13 = scmp.lt.u32.totalorder %s2644_s17, %s2640_s19  ;;  %p2648_p1 = scmp.lt.u32.totalorder %s2640_s19, %s3158_s22 }
 0x8c8   : > { %p2642_p9 = pnand %p2641_p11, %p2969_p5 }
 0x8c9   : > { %p2647_p4 = por %p2646_p13, %p2645_p2 }
 0x8ca   : > { %p2643_p0 = pneg %p2642_p9 }
 0x8cb   : > { %p2649_p8 = por %p2648_p1, %p2647_p4 }
 0x8cd   : > { %p2650_p10 = pnand %p2649_p8, %p2643_p0 }
 0x8cf   : > { %2653 = shalt.err (!%p2650_p10)
}
 0x8d0   : > { %s2737_s16 = smov 128   ;;  %s2738_s27 = smov 8  }
 0x8d1   : > { %2305 = dma.vmem_to_hbm [thread:$0]  (%p2969_p5), %s3153_s12, 256, %s3158_s22, %s1761_s26, %s2737_s16, %s2737_s16, %s2738_s27  }
 0x8d2 PF: > { %s3262_s3 = sld [smem:[#allocation20_spill]]  ;;  %s3263_s30 = sld [smem:[#allocation22_spill]] }
 0x8d3   : > { %p3265_p7 = scmp.ge.s32.totalorder %s2724_s14, 2 }
 0x8d8   : > { %s1791_s20 = sand.u32 1, %s3262_s3   ;;  %p3264_p3 = scmp.ne.s32.totalorder %s3263_s30, 0 }
 0x8d9   : > { %s1792_s21 = scalar_lea.sflag [#allocation4], %s1791_s20 }
 0x8da   : > { %p2328_p12 = pnand %p3265_p7, %p3264_p3 }
 0x8dc   : > { %2699 = dma.done.wait (!%p2328_p12), %s1792_s21, 256  }
 0x8dd   : > { %2701 = vsyncadd (!%p2328_p12), %s1792_s21, 4294967040  ;;  %s30_s14 = sadd.s32 1, %s2724_s14   ;;  %s3266_s30 = smov %s2708_s10 }
 0x8de   : > { %p27_p6 = scmp.ge.s32.totalorder %s30_s14, 4   ;;  %s3267_s10 = smov %s2712_s11 }
 0x8df   : > { %s3268_s11 = smov %s2980_s23  ;;  %s3269_s12 = smov %s2720_s13 }
 0x8e0   : > { %s3270_s13 = smov %s3272_s18  ;;  %29 = sbr.rel (!%p27_p6) target bundleno = 16 (0x10), region = 145 }
 0x8e7   :  { %1797 = vsyncpa [#allocation3], 1 }
 0x8e8   :  { %1799 = vsyncpa [#allocation3 + $0x1], 1 }
 0x8e9   :  { %1800 = vsyncpa [#allocation6], 1 }
 0x8ea   :  { %1802 = vsyncpa [#allocation6 + $0x1], 1 }
 0x8eb   :  { %1803 = vsyncpa [#allocation9], 1 }
 0x8ec   :  { %1804 = vsyncpa [#allocation12], 1 }
 0x8ed   :  { %1805 = vsyncpa [#allocation4], 1 }
 0x8ee   :  { %1807 = vsyncpa [#allocation4 + $0x1], 1 }

</bundles_post_ra>
